<compile_context>
chip_gen: v6e
topology: v6e:2x2x1
jax: 0.10.0
libtpu: 0.0.40
codegen_flags: <defaults>
</compile_context>

<pallas_src>
import functools

import jax
import jax.numpy as jnp
from jax.experimental import pallas as pl
from jax.experimental.pallas import tpu as pltpu


def _round_up(x, m):
    return (x + m - 1) // m * m


def _vmem_capacity_bytes():
    # Fall back to the v7x floor (64 MiB) so tile choices are safe everywhere.
    try:
        return int(pltpu.get_tpu_info().vmem_capacity_bytes)
    except Exception:
        return 64 * 1024 * 1024


# ----------------------------------------------------------------------------
# Kernel 1: fused LayerNorm + Linear (LN affine folded into the weight).
#   x: (B, L, D)   w_eff: (D, P)   b_eff: (1, P)   out: (B, L, P)
# ----------------------------------------------------------------------------
def _norm_linear_kernel(x_ref, w_ref, b_ref, o_ref):
    x = x_ref[0].astype(jnp.float32)                      # (TL, D)
    mean = jnp.mean(x, axis=-1, keepdims=True)
    xc = x - mean
    var = jnp.mean(xc * xc, axis=-1, keepdims=True)
    xn = xc * jax.lax.rsqrt(var + 1e-5)                   # LayerNorm eps=1e-5
    # gamma/beta already folded into w_eff/b_eff by the wrapper.
    acc = jnp.dot(xn.astype(w_ref.dtype), w_ref[...],
                  preferred_element_type=jnp.float32)
    o_ref[0] = (acc + b_ref[...].astype(jnp.float32)).astype(o_ref.dtype)


def _choose_token_tile(L, D, P, isz, budget):
    if L <= 1024:
        return L                        # full-extent block is always legal
    tl = 2048
    while tl > 8:
        need = 2 * tl * D * isz + 2 * tl * P * isz + D * P * isz  # dbl-buffered
        if tl <= L and need <= budget:
            break
        tl //= 2
    return max(tl, 8)


def norm_linear(x, w_eff, b_eff):
    B, L, D = x.shape
    P = w_eff.shape[1]
    isz = jnp.dtype(x.dtype).itemsize
    cap = _vmem_capacity_bytes()
    tl = _choose_token_tile(L, D, P, isz, budget=int(0.55 * cap))
    grid = (B, pl.cdiv(L, tl))
    flops = int(2 * B * L * D * P + 5 * B * L * D)
    bytes_accessed = int(isz * (B * L * D + B * L * P + D * P + P))
    return pl.pallas_call(
        _norm_linear_kernel,
        out_shape=jax.ShapeDtypeStruct((B, L, P), x.dtype),
        grid=grid,
        in_specs=[
            pl.BlockSpec((1, tl, D), lambda bi, ti: (bi, ti, 0)),
            pl.BlockSpec((D, P), lambda bi, ti: (0, 0)),
            pl.BlockSpec((1, P), lambda bi, ti: (0, 0)),
        ],
        # Keep the narrow P (=p*p*C) output: padding to 128 lanes would write
        # 8x more intermediate HBM while the kernel is bound on streaming x.
        out_specs=pl.BlockSpec((1, tl, P), lambda bi, ti: (bi, ti, 0)),
        compiler_params=pltpu.CompilerParams(
            dimension_semantics=("parallel", "parallel"),
            vmem_limit_bytes=min(int(0.75 * cap), 112 * 1024 * 1024),
        ),
        cost_estimate=pl.CostEstimate(
            flops=flops, transcendentals=int(B * L),
            bytes_accessed=bytes_accessed),
    )(x, w_eff, b_eff.reshape(1, P))


# ----------------------------------------------------------------------------
# Kernel 2: 3x3 conv, stride 1, padding 1, on a lane-dense flattened layout.
#   xpad:  (B, Cin, HALO + Spad + HALO)   zero-padded flattened image
#   row/col: (1, Spad) int32              per-pixel row / column index
#   w:     (9, Cout, Cin) f32              tap-major weight blocks
#   bias:  (Cout, 1) f32
#   out:   (B, Cout, Spad)   -> wrapper slices to S = H*W
# Shifts are pltpu.roll on an aligned window (XLU); validity is enforced with
# iota masks; per tap a small MXU matmul accumulates into a (Cout, TS) slab.
# ----------------------------------------------------------------------------
_TAPS = tuple((di, dj) for di in (-1, 0, 1) for dj in (-1, 0, 1))


def _conv3x3_kernel(row_ref, col_ref, x_ref, w_ref, b_ref, o_ref, *,
                    H, W, Cin, Cout, TS, HALO, NT):
    Lw = TS + 2 * HALO
    if NT == 1:
        base = 0
    else:
        base = pl.multiple_of(pl.program_id(1) * TS, 128)
    win = x_ref[0, :, pl.ds(base, Lw)].astype(jnp.float32)      # (Cin, Lw)
    row = row_ref[...]                                          # (1, TS) int32
    col = col_ref[...]
    acc = jnp.zeros((Cout, TS), jnp.float32)
    for idx, (di, dj) in enumerate(_TAPS):
        mask = ((row + di >= 0) & (row + di < H) &
                (col + dj >= 0) & (col + dj < W))               # (1, TS)
        shift = (Lw - HALO - (di * W + dj)) % Lw                # static int
        tap = pltpu.roll(win, shift=shift, axis=1)[:, :TS]      # (Cin, TS)
        tap = jnp.where(mask, tap, 0.0)
        acc = acc + jnp.dot(w_ref[idx], tap,
                            preferred_element_type=jnp.float32)
    o_ref[0] = (acc + b_ref[...]).astype(o_ref.dtype)           # one dense store


def conv3x3(img_flat, H, W, w_hwio, bias):
    B, Cin, S = img_flat.shape
    assert S == H * W
    Cout = w_hwio.shape[-1]
    # Spatial tiles: multiples of 128 lanes, capped so accumulators/taps stay
    # within a few vregs' worth per step (bounds live ranges, feeds both TCs).
    ntiles = max(1, pl.cdiv(S, 4096))
    TS = _round_up(pl.cdiv(S, ntiles), 128)
    ntiles = pl.cdiv(S, TS)
    Spad = ntiles * TS
    HALO = _round_up(W + 1, 128)
    Ptot = Spad + 2 * HALO
    xpad = jnp.pad(img_flat, ((0, 0), (0, 0), (HALO, Ptot - HALO - S)))
    pos = jnp.arange(Spad, dtype=jnp.int32)
    row = (pos // W).reshape(1, Spad)
    col = (pos % W).reshape(1, Spad)
    # w_taps[tap, co, ci] == w_hwio[ki, kj, ci, co], tap = ki*3 + kj.
    w_taps = jnp.transpose(w_hwio, (0, 1, 3, 2)).reshape(9, Cout, Cin)
    w_taps = w_taps.astype(jnp.float32)
    b2 = bias.reshape(Cout, 1).astype(jnp.float32)
    kernel = functools.partial(_conv3x3_kernel, H=H, W=W, Cin=Cin, Cout=Cout,
                               TS=TS, HALO=HALO, NT=ntiles)
    isz = jnp.dtype(img_flat.dtype).itemsize
    out = pl.pallas_call(
        kernel,
        out_shape=jax.ShapeDtypeStruct((B, Cout, Spad), img_flat.dtype),
        grid=(B, ntiles),
        in_specs=[
            pl.BlockSpec((1, TS), lambda b, t: (0, t)),            # row idx
            pl.BlockSpec((1, TS), lambda b, t: (0, t)),            # col idx
            pl.BlockSpec((1, Cin, Ptot), lambda b, t: (b, 0, 0)),  # resident img
            pl.BlockSpec((9, Cout, Cin), lambda b, t: (0, 0, 0)),
            pl.BlockSpec((Cout, 1), lambda b, t: (0, 0)),
        ],
        out_specs=pl.BlockSpec((1, Cout, TS), lambda b, t: (b, 0, t)),
        compiler_params=pltpu.CompilerParams(
            dimension_semantics=("parallel", "parallel")),
        cost_estimate=pl.CostEstimate(
            flops=int(2 * 9 * B * Cin * Cout * S), transcendentals=0,
            bytes_accessed=int(isz * B * (Cin + Cout) * S
                               + 4 * (9 * Cin * Cout + Cout))),
    )(row, col, xpad, w_taps, b2)
    return out[:, :, :S]


# ----------------------------------------------------------------------------
# Glue: unpatchify  'B (h w) (p1 p2 C) -> B C (h p1) (w p2)'  (NCHW).
# TODO(synk): this permutation stays in XLA; it only touches the small
# (B, hw, p*p*C) tensor and has no clean lane-aligned in-kernel equivalent.
# ----------------------------------------------------------------------------
def unpatchify_nchw(y, channels):
    B, L, PPc = y.shape
    p = int(round((PPc // channels) ** 0.5))
    h = w = int(round(L ** 0.5))
    assert h * w == L and p * p * channels == PPc
    y = y.reshape(B, h, w, p, p, channels)
    y = y.transpose(0, 5, 1, 3, 2, 4)            # B C h p1 w p2
    return y.reshape(B, channels, h * p, w * p)


def final_layer_forward(x, params, *, out_channels, extras):
    gamma = params["ln_g"].astype(jnp.float32)
    beta = params["ln_b"].astype(jnp.float32)
    w = params["lin_w"]
    # Fold LayerNorm's affine into the linear layer (trace-time, zero HBM):
    #   (xn*g + b) @ W + c  ==  xn @ (g[:,None]*W) + (b @ W + c)
    w_eff = (gamma[:, None] * w.astype(jnp.float32)).astype(w.dtype)
    b_eff = beta @ w.astype(jnp.float32) + params["lin_b"].astype(jnp.float32)
    y = norm_linear(x, w_eff, b_eff.astype(x.dtype))            # (B, L, p*p*C)
    img = unpatchify_nchw(y[:, extras:, :], out_channels)       # (B, C, H, W)
    B, C, H, W = img.shape
    out_flat = conv3x3(img.reshape(B, C, H * W), H, W,
                       params["conv_w_hwio"], params["conv_b"])
    return out_flat.reshape(B, C, H, W)


# ----------------------------------------------------------------------------
# Pure-JAX reference for verification (uses the unfolded params).
# ----------------------------------------------------------------------------
def reference_forward(x, params, *, out_channels, extras):
    mean = jnp.mean(x, axis=-1, keepdims=True)
    var = jnp.mean((x - mean) ** 2, axis=-1, keepdims=True)
    xn = (x - mean) * jax.lax.rsqrt(var + 1e-5)
    y = xn * params["ln_g"] + params["ln_b"]
    y = y @ params["lin_w"] + params["lin_b"]
    y = y[:, extras:, :]
    img = unpatchify_nchw(y, out_channels)                       # NCHW
    w_oihw = params["conv_w_hwio"].transpose(3, 2, 0, 1)
    out = jax.lax.conv_general_dilated(
        img, w_oihw, window_strides=(1, 1), padding="SAME",
        dimension_numbers=("NCHW", "OIHW", "NCHW"),
    )
    return out + params["conv_b"][None, :, None, None]


if __name__ == "__main__":
    # Small shapes consistent with the module.
    dim, patch_size, out_channels, extras = 32, 2, 4, 1
    B, h = 2, 4
    L = extras + h * h                       # 17 tokens
    P = patch_size * patch_size * out_channels

    key = jax.random.PRNGKey(0)
    k0, k1, k2, k3, k4, k5, k6 = jax.random.split(key, 7)

    x = jax.random.normal(k0, (B, L, dim), jnp.float32)
    params = {
        "ln_g": 1.0 + 0.1 * jax.random.normal(k1, (dim,), jnp.float32),
        "ln_b": 0.1 * jax.random.normal(k2, (dim,), jnp.float32),
        "lin_w": jax.random.normal(k3, (dim, P), jnp.float32) / jnp.sqrt(dim),
        "lin_b": 0.1 * jax.random.normal(k4, (P,), jnp.float32),
        "conv_w_hwio": jax.random.normal(
            k5, (3, 3, out_channels, out_channels), jnp.float32
        ) / jnp.sqrt(9 * out_channels),
        "conv_b": 0.1 * jax.random.normal(k6, (out_channels,), jnp.float32),
    }

    out = final_layer_forward(x, params, out_channels=out_channels, extras=extras)
    out = jax.block_until_ready(out)

    ref = reference_forward(x, params, out_channels=out_channels, extras=extras)
    assert out.shape == (B, out_channels, h * patch_size, h * patch_size)
    # NOTE: demo runs in f32; for bf16 weights (MXU fed in w.dtype) loosen tols.
    assert jnp.allclose(out, ref, rtol=1e-4, atol=1e-4)

    print("KERNEL_OK")
</pallas_src>

<mosaic_0001>
module attributes {stable_mosaic.version = 11 : i64} {
  func.func @_norm_linear_kernel(%arg0: i32, %arg1: i32, %arg2: memref<1x17x32xf32, #tpu.memory_space<vmem>>, %arg3: memref<32x16xf32, #tpu.memory_space<vmem>>, %arg4: memref<1x16xf32, #tpu.memory_space<vmem>>, %arg5: memref<1x17x16xf32, #tpu.memory_space<vmem>>) attributes {dimension_semantics = [#tpu.dimension_semantics<parallel>, #tpu.dimension_semantics<parallel>], iteration_bounds = array<i64: 2, 1>, scalar_prefetch = 0 : i64, scratch_operands = 0 : i64, tpu.core_type = #tpu.core_type<tc>, window_params = [{transform_indices = @transform_0, window_bounds = array<i64: 1, 17, 32>}, {pipeline_mode = #tpu.pipeline_mode<synchronous>, transform_indices = @transform_1, window_bounds = array<i64: 32, 16>}, {pipeline_mode = #tpu.pipeline_mode<synchronous>, transform_indices = @transform_2, window_bounds = array<i64: 1, 16>}, {transform_indices = @transform_3, window_bounds = array<i64: 1, 17, 16>}]} {
    %c0 = arith.constant 0 : index
    %c0_0 = arith.constant 0 : index
    %c0_1 = arith.constant 0 : index
    %0 = vector.load %arg2[%c0, %c0_0, %c0_1] : memref<1x17x32xf32, #tpu.memory_space<vmem>>, vector<1x17x32xf32>
    %1 = vector.shape_cast %0 : vector<1x17x32xf32> to vector<17x32xf32>
    %cst = arith.constant dense<0.000000e+00> : vector<17xf32>
    %2 = vector.multi_reduction <add>, %1, %cst [1] : vector<17x32xf32> to vector<17xf32>
    %3 = vector.shape_cast %2 : vector<17xf32> to vector<17x1xf32>
    %cst_2 = arith.constant 3.200000e+01 : f32
    %4 = vector.broadcast %cst_2 : f32 to vector<17x1xf32>
    %5 = arith.divf %3, %4 : vector<17x1xf32>
    %6 = vector.broadcast %5 : vector<17x1xf32> to vector<17x32xf32>
    %7 = arith.subf %1, %6 : vector<17x32xf32>
    %8 = arith.mulf %7, %7 : vector<17x32xf32>
    %cst_3 = arith.constant dense<0.000000e+00> : vector<17xf32>
    %9 = vector.multi_reduction <add>, %8, %cst_3 [1] : vector<17x32xf32> to vector<17xf32>
    %10 = vector.shape_cast %9 : vector<17xf32> to vector<17x1xf32>
    %cst_4 = arith.constant 3.200000e+01 : f32
    %11 = vector.broadcast %cst_4 : f32 to vector<17x1xf32>
    %12 = arith.divf %10, %11 : vector<17x1xf32>
    %cst_5 = arith.constant 9.99999974E-6 : f32
    %13 = vector.broadcast %cst_5 : f32 to vector<17x1xf32>
    %14 = arith.addf %12, %13 : vector<17x1xf32>
    %15 = math.rsqrt %14 : vector<17x1xf32>
    %16 = vector.broadcast %15 : vector<17x1xf32> to vector<17x32xf32>
    %17 = arith.mulf %7, %16 : vector<17x32xf32>
    %c0_6 = arith.constant 0 : index
    %c0_7 = arith.constant 0 : index
    %18 = vector.load %arg3[%c0_6, %c0_7] : memref<32x16xf32, #tpu.memory_space<vmem>>, vector<32x16xf32>
    %cst_8 = arith.constant dense<0.000000e+00> : vector<17x16xf32>
    %19 = tpu.matmul %17, %18, %cst_8 {dimension_numbers = #tpu.dot_dimension_numbers<[1], [0], [0], [1], [0, 0, 1, 1], [], []>} : vector<17x32xf32>, vector<32x16xf32>, vector<17x16xf32> -> vector<17x16xf32>
    %c0_9 = arith.constant 0 : index
    %c0_10 = arith.constant 0 : index
    %20 = vector.load %arg4[%c0_9, %c0_10] : memref<1x16xf32, #tpu.memory_space<vmem>>, vector<1x16xf32>
    %21 = vector.broadcast %20 : vector<1x16xf32> to vector<17x16xf32>
    %22 = arith.addf %19, %21 : vector<17x16xf32>
    %c0_11 = arith.constant 0 : index
    %c0_12 = arith.constant 0 : index
    %c0_13 = arith.constant 0 : index
    %23 = vector.load %arg5[%c0_11, %c0_12, %c0_13] : memref<1x17x16xf32, #tpu.memory_space<vmem>>, vector<1x17x16xf32>
    %24 = vector.shape_cast %23 : vector<1x17x16xf32> to vector<17x16xf32>
    %25 = vector.shape_cast %22 : vector<17x16xf32> to vector<1x17x16xf32>
    tpu.vector_store %arg5[%c0_11, %c0_12, %c0_13], %25 {strides = array<i32>} : memref<1x17x16xf32, #tpu.memory_space<vmem>>, vector<1x17x16xf32>,
    return
  }
  func.func @transform_0(%arg0: i32, %arg1: i32) -> (i32, i32, i32) {
    %c0_i32 = arith.constant 0 : i32
    %c0_i32_0 = arith.constant 0 : i32
    return %arg0, %arg1, %c0_i32 : i32, i32, i32
  }
  func.func @transform_1(%arg0: i32, %arg1: i32) -> (i32, i32) {
    %c0_i32 = arith.constant 0 : i32
    %c0_i32_0 = arith.constant 0 : i32
    %c0_i32_1 = arith.constant 0 : i32
    return %c0_i32, %c0_i32_0 : i32, i32
  }
  func.func @transform_2(%arg0: i32, %arg1: i32) -> (i32, i32) {
    %c0_i32 = arith.constant 0 : i32
    %c0_i32_0 = arith.constant 0 : i32
    %c0_i32_1 = arith.constant 0 : i32
    return %c0_i32, %c0_i32_0 : i32, i32
  }
  func.func @transform_3(%arg0: i32, %arg1: i32) -> (i32, i32, i32) {
    %c0_i32 = arith.constant 0 : i32
    %c0_i32_0 = arith.constant 0 : i32
    return %arg0, %arg1, %c0_i32 : i32, i32, i32
  }
}

</mosaic_0001>

<bundles_post_ra>
// kernel: tpu_custom_call.1
= control target key start
LH: loop header
LB: loop body
LE: loop exit
PB: predicated region body
PF: predicated region fallthrough
CT: control target
= control target key end

     0   :  { %s571_s12 = smov 0   ;;  %s573_s13 = smov 0   ;;  %s638_s0 = inlined_call_operand.vmem [shape: f32[2,17,32], index: 0, kind: input, shape index: {}]   ;;  %s639_s1 = inlined_call_operand.vmem [shape: f32[32,16], index: 1, kind: input, shape index: {}]   ;;  %s640_s2 = inlined_call_operand.vmem [shape: f32[1,16], index: 2, kind: input, shape index: {}]   ;;  %s641_s3 = inlined_call_operand.vmem [shape: f32[2,17,16], index: 3, kind: output, shape index: {}]  }
   0x1   :  { %s575_s14 = smov 0  }
   0x2 LB: > { %s25_s15 = sadd.s32 1, %s543_s13  ;;  %p451_p0 = scmp.ge.s32.totalorder %s547_s14, 1  ;;  %s547_s14 = sphi %s575_s14, %s13_s14   ;;  %s543_s13 = sphi %s573_s13, %s643_s13   ;;  %s539_s12 = sphi %s571_s12, %s642_s12  }
   0x3   : > { %p27_p1 = scmp.ge.s32.totalorder %s25_s15, 2  ;;  %p158_p2 = scmp.lt.s32.totalorder %s547_s14, 3 }
   0x5   : > { %s645_s15 = smov (%p27_p1, %s25_s15), 0  ;;  %p159_p3 = pnand %p451_p0, %p158_p2 }
   0x6   : > { %p191_p4 = scmp.lt.s32.totalorder (!%p159_p3), %s539_s12, 1 }
   0x7   : > { %162 = sbr.rel (%p159_p3) target bundleno = 522 (0x20a), region = 32 }
   0xc   : > { %s647_s12 = smov (!%p191_p4, %s539_s12), 1  ;;  %vm213_vm0 = vcmask 261120   ;;  %vm220_vm1 = vcmask 253952   ;;  %v258_v21 = vld [vmem:[%s639_s1 + $0x18] sm:$0xff]  ;;  %v549_v22 = vmov 0.0   ;;  %v257_v23 = vld [vmem:[%s639_s1 + $0x10] sm:$0xff] }
   0xd   : > { %s492_s16 = smul.u32 24, %s647_s12  ;;  %484 = vmatprep.subr.mxu1 %v549_v22  ;;  %467 = vmatprep.subr.mxu0 %v549_v22  ;;  %v256_v24 = vld [vmem:[%s639_s1 + $0x8] sm:$0xff]  ;;  %v255_v25 = vld [vmem:[%s639_s1] sm:$0xff]  ;;  %vm550_vm2 = vmmov 0   ;;  %vm355_vm3 = vcmask 130048   ;;  %vm358_vm4 = vcmask 122880  }
   0xe   : > { %488 = vmatpush3.msra.mxu1 %v258_v21  ;;  %468 = vmatpush3.msra.mxu0 %v258_v21  ;;  %v454_v41 = vld [vmem:[%s640_s2] ss:$0 sm:$0xff] }
   0xf   : > { %s198_s19 = scalar_lea.vmem %s638_s0, %s492_s16  ;;  %485 = vmatprep.subr.mxu1 %v549_v22  ;;  %469 = vmatprep.subr.mxu0 %v549_v22  ;;  %s208_s5 = scalar_lea.vmem %s641_s3, %s492_s16 }
  0x10   : > { %v211_v0 = vld [vmem:[%s198_s19 + $0x8] sm:$0xff]  ;;  %v212_v1 = vld [vmem:[%s198_s19 + $0x10] sm:$0x1]  ;;  %v210_v2 = vld [vmem:[%s198_s19] sm:$0xff]  ;;  %489 = vmatpush3.msra.mxu1 %v257_v23  ;;  %470 = vmatpush3.msra.mxu0 %v257_v23 }
  0x11   : > { %v217_v3 = vsel %vm213_vm0, %v211_v0, 0.0  ;;  %v221_v4 = vsel %vm220_vm1, %v212_v1, 0.0  ;;  %v214_v5 = vsel %vm213_vm0, %v210_v2, 0.0  ;;  %486 = vmatprep.subr.mxu1 %v549_v22  ;;  %478 = vmatprep.mubr.msk.f32.mxu1 %vm550_vm2, %v549_v22 }
  0x12   : > { %218 = vadd.xlane.f32.xlu0 %v217_v3  ;;  %222 = vadd.xlane.f32.xlu1 %v221_v4 }
  0x13   : > { %490 = vmatpush3.msra.mxu1 %v256_v24  ;;  %471 = vmatprep.subr.mxu0 %v549_v22 }
  0x14   : > { %487 = vmatprep.subr.mxu1 %v549_v22  ;;  %472 = vmatpush3.msra.mxu0 %v256_v24 }
  0x15   : > { %491 = vmatpush3.msra.mxu1 %v255_v25  ;;  %473 = vmatprep.subr.mxu0 %v549_v22 }
  0x16   : > { %215 = vadd.xlane.f32.xlu0 %v214_v5  ;;  %474 = vmatpush3.msra.mxu0 %v255_v25 }
  0x17   : > { %475 = vmatprep.mubr.msk.f32.mxu0 %vm550_vm2, %v549_v22 }
  0x9b   : > { %v219_v6 = vpop.xlane.xlu0 %218  ;;  %v223_v7 = vpop.xlane.xlu1 %222 }
  0x9c   : > { %v226_v8 = vmul.f32 0.03125, %v219_v6  ;;  %v227_v9 = vmul.f32 0.03125, %v223_v7 }
  0x9e   : > { %v229_v10 = vsub.f32 %v211_v0, %v226_v8  ;;  %v230_v11 = vsub.f32 %v212_v1, %v227_v9 }
  0x9f   : > { %v216_v12 = vpop.xlane.xlu0 %215 }
  0xa0   : > { %v225_v13 = vmul.f32 0.03125, %v216_v12  ;;  %v232_v14 = vmul.f32 %v229_v10, %v229_v10  ;;  %v233_v15 = vmul.f32 %v230_v11, %v230_v11 }
  0xa2   : > { %v228_v16 = vsub.f32 %v210_v2, %v225_v13  ;;  %v237_v17 = vsel %vm213_vm0, %v232_v14, 0.0  ;;  %v240_v18 = vsel %vm220_vm1, %v233_v15, 0.0 }
  0xa3   : > { %238 = vadd.xlane.f32.xlu1 %v237_v17 }
  0xa4   : > { %v231_v19 = vmul.f32 %v228_v16, %v228_v16 }
  0xa6   : > { %v234_v20 = vsel %vm213_vm0, %v231_v19, 0.0 }
  0xa7   : > { %241 = vadd.xlane.f32.xlu1 %v240_v18  ;;  %235 = vadd.xlane.f32.xlu0 %v234_v20 }
 0x12c   : > { %v239_v26 = vpop.xlane.xlu1 %238 }
 0x12d   : > { %v244_v27 = vmul.f32 0.03125, %v239_v26 }
 0x12f   : > { %v247_v28 = vadd.f32 1e-05, %v244_v27 }
 0x130   : > { %v242_v29 = vpop.xlane.xlu1 %241  ;;  %v236_v30 = vpop.xlane.xlu0 %235 }
 0x131   : > { %519 = vrsqrt.f32 %v247_v28  ;;  %v245_v31 = vmul.f32 0.03125, %v242_v29  ;;  %v243_v32 = vmul.f32 0.03125, %v236_v30 }
 0x133   : > { %v248_v33 = vadd.f32 1e-05, %v245_v31  ;;  %v246_v34 = vadd.f32 1e-05, %v243_v32 }
 0x135   : > { %521 = vrsqrt.f32 %v248_v33 }
 0x136   : > { %523 = vrsqrt.f32 %v246_v34 }
 0x13e   : > { %v520_v35 = vpop.eup %519 }
 0x13f   : > { %v253_v36 = vmul.f32 %v520_v35, %v229_v10 }
 0x141   : > { %479 = vmatmul.mubr.msk.f32.vlgmr.msra.gmra.mxu1 %vm213_vm0, %v253_v36 }
 0x142   : > { %v522_v37 = vpop.eup %521  ;;  %481 = vmatprep.mubr.msk.f32.mxu1 %vm550_vm2, %v549_v22 }
 0x143   : > { %v524_v38 = vpop.eup %523  ;;  %v254_v39 = vmul.f32 %v522_v37, %v230_v11 }
 0x144   : > { %v252_v40 = vmul.f32 %v524_v38, %v228_v16 }
 0x145   : > { %482 = vmatmul.mubr.msk.f32.gmra.mxu1 %vm213_vm0, %v254_v39 }
 0x146   : > { %476 = vmatmul.mubr.msk.f32.vlgmr.msra.gmra.mxu0 %vm213_vm0, %v252_v40 }
 0x201   : > { %v346_v42 = vpop.f32.mrf.mxu1 }
 0x202   : > { %v347_v43 = vadd.f32 %v454_v41, %v346_v42 }
 0x203   : > { %v480_v44 = vpop.f32.mrf.mxu1 }
 0x204   : > { %357 = vst.msk [vmem:[%s208_s5 + $0x8] sm:$0xff] %vm355_vm3, %v347_v43 }
 0x205   : > { %v351_v45 = vpop.f32.mrf.mxu1 }
 0x206   : > { %v341_v46 = vpop.f32.mrf.mxu0  ;;  %v352_v47 = vadd.f32 %v454_v41, %v351_v45 }
 0x207   : > { %v342_v48 = vadd.f32 %v454_v41, %v341_v46  ;;  %v483_v49 = vpop.f32.mrf.mxu1 }
 0x208   : > { %359 = vst.msk [vmem:[%s208_s5 + $0x10] sm:$0x1] %vm358_vm4, %v352_v47  ;;  %v477_v50 = vpop.f32.mrf.mxu0 }
 0x209   : > { %356 = vst.msk [vmem:[%s208_s5] sm:$0xff] %vm355_vm3, %v342_v48 }
 0x20a PF: > { %s13_s14 = sadd.s32 1, %s547_s14   ;;  %s642_s12 = smov %s543_s13 }
 0x20b   : > { %p10_p5 = scmp.ge.s32.totalorder %s13_s14, 4   ;;  %s643_s13 = smov %s645_s15 }
 0x20d   :  { %12 = sbr.rel (!%p10_p5) target bundleno = 2 (0x2), region = 62 }

</bundles_post_ra>
